<compile_context>
chip_gen: v7x
topology: tpu7x:2x2x1
jax: 0.10.0
libtpu: 0.0.40
codegen_flags: <defaults>
</compile_context>

<pallas_src>
import math

import jax
import jax.numpy as jnp
from jax.experimental import pallas as pl
from jax.experimental.pallas import tpu as pltpu

_BN_EPS = 1e-5
_LANE = 128
_SUBLANE_BF16 = 16   # native bf16 sublane tile


def _round_up(x, m):
    return ((x + m - 1) // m) * m


def _pad2d(a, rows, cols):
    r, c = a.shape
    return jnp.pad(a, ((0, rows - r), (0, cols - c)))


def _pad1d(a, n):
    return jnp.pad(a, (0, n - a.shape[0]))


def _vmem_capacity_bytes():
    """Generation-aware VMEM capacity (falls back to the smallest, v7x per-TC)."""
    try:
        cap = getattr(pltpu.get_tpu_info(), "vmem_capacity_bytes", None)
        if cap:
            return int(cap)
    except Exception:
        pass
    return 64 * 1024 * 1024


def _make_fused_mlp_kernel(nlayers, wshapes, batch_valid, batch_padded):
    """Fused kernel: all layers chained in one body, weights double-buffered from HBM."""
    need_mask = batch_padded != batch_valid
    n_pad = float(batch_padded - batch_valid)
    inv_b = 1.0 / float(batch_valid)

    def kernel(*refs):
        x_ref, g_ref, bt_ref, bl_ref = refs[:4]
        w_refs = refs[4:4 + nlayers]           # raw HBM refs (memory_space=pl.ANY)
        o_ref = refs[4 + nlayers]
        wbuf = refs[4 + nlayers + 1]           # VMEM (2, max_ip, max_op) bf16
        sem = refs[4 + nlayers + 2]            # DMA semaphores (2,)

        def weight_copy(li, slot):
            ip, op = wshapes[li]
            return pltpu.make_async_copy(
                w_refs[li], wbuf.at[slot, :ip, :op], sem.at[slot])

        # Prime layer 0's weight DMA; subsequent layers are prefetched while the
        # previous layer computes.
        pending = weight_copy(0, 0)
        pending.start()

        h = x_ref[...]                         # bf16 [Bp, nin_p]
        if need_mask:
            row = jax.lax.broadcasted_iota(jnp.int32, (batch_padded, 1), 0)
            valid = row < batch_valid          # [Bp, 1] bool

        for li in range(nlayers):
            slot = li & 1
            pending.wait()
            if li + 1 < nlayers:
                pending = weight_copy(li + 1, 1 - slot)
                pending.start()

            ip, op = wshapes[li]
            w = wbuf[slot, :ip, :op]                                   # bf16
            y = jnp.dot(h, w, preferred_element_type=jnp.float32)      # f32 [Bp, op]

            if li < nlayers - 1:
                # BatchNorm1d (training-mode batch stats), bias cancelled exactly.
                # Padded batch rows of y are exactly zero -> no mask in the sums.
                mean = jnp.sum(y, axis=0, keepdims=True) * inv_b       # [1, op]
                d = y - mean
                ssq = jnp.sum(d * d, axis=0, keepdims=True)
                if need_mask:
                    # remove the n_pad * mean^2 contributed by the zero padded rows
                    ssq = ssq - n_pad * (mean * mean)
                var = jnp.maximum(ssq * inv_b, 0.0)
                scale = g_ref[li:li + 1, :] * jax.lax.rsqrt(var + _BN_EPS)
                shift = bt_ref[li:li + 1, :] - mean * scale
                a = jnp.maximum(y * scale + shift, 0.0)                # fused BN + ReLU
                if need_mask:
                    a = jnp.where(valid, a, 0.0)   # keep padded rows exactly zero
                h = a.astype(jnp.bfloat16)
            else:
                # Final layer: Linear only (bias kept).
                o_ref[...] = y + bl_ref[...]

    return kernel


def init_mlp_params(key, nin, nmid, nout, nlayers):
    """Deterministic parameter init matching the PyTorch module's __init__."""
    assert nlayers > 1
    dims = [nin] + [nmid] * (nlayers - 1) + [nout]
    params = []
    for li in range(nlayers):
        c_in, c_out = dims[li], dims[li + 1]
        key, kw, kg = jax.random.split(key, 3)
        # kaiming_uniform_(a=sqrt(5)) on (c_out, c_in) -> U(-1/sqrt(c_in), 1/sqrt(c_in))
        bound = 1.0 / math.sqrt(c_in)
        w = jax.random.uniform(kw, (c_out, c_in), jnp.float32, -bound, bound)
        p = {
            "w_t": w.T,                              # [in, out], f32
            "b": jnp.zeros((c_out,), jnp.float32),   # LinearModule zeroes the bias
        }
        if li < nlayers - 1:
            p["gamma"] = jax.random.uniform(kg, (c_out,), jnp.float32, 0.0, 1.0)
            p["beta"] = jnp.zeros((c_out,), jnp.float32)
        params.append(p)
    return params


def mlp_forward(params, x):
    """Fused forward: one pallas_call for the whole MLP."""
    B, nin = x.shape
    nlayers = len(params)
    assert nlayers > 1
    assert params[0]["w_t"].shape[0] == nin

    dims = [nin] + [p["w_t"].shape[1] for p in params]
    # Module spec: all hidden widths equal nmid -> gamma/beta stack cleanly.
    assert all(d == dims[1] for d in dims[1:-1])

    Bp = _round_up(B, _SUBLANE_BF16)
    dims_p = [_round_up(d, _LANE) for d in dims]
    nmid_p = dims_p[1]

    # ---- small VMEM-resident inputs (lane-dense, zero padded) ----
    x_p = _pad2d(x.astype(jnp.float32), Bp, dims_p[0]).astype(jnp.bfloat16)
    gammas = jnp.stack([_pad1d(params[li]["gamma"], nmid_p) for li in range(nlayers - 1)])
    betas = jnp.stack([_pad1d(params[li]["beta"], nmid_p) for li in range(nlayers - 1)])
    b_last = _pad1d(params[-1]["b"], dims_p[-1])[None, :]

    # ---- weights stay in HBM; kernel double-buffers them manually ----
    w_list, wshapes = [], []
    for li, p in enumerate(params):
        ip, op = dims_p[li], dims_p[li + 1]
        w_list.append(_pad2d(p["w_t"], ip, op).astype(jnp.bfloat16))
        wshapes.append((ip, op))
    max_ip = max(s[0] for s in wshapes)
    max_op = max(s[1] for s in wshapes)

    # ---- generation-aware VMEM budget ----
    vmem_cap = _vmem_capacity_bytes()
    budget = int(0.70 * vmem_cap)
    wbuf_bytes = 2 * max_ip * max_op * 2                         # 2-slot bf16 weight buffer
    small_bytes = (Bp * dims_p[0] * 2                            # x (bf16)
                   + 2 * _round_up(nlayers - 1, 8) * nmid_p * 4  # gammas + betas (f32)
                   + 8 * dims_p[-1] * 4                          # b_last (sublane-padded)
                   + Bp * dims_p[-1] * 4)                        # output (f32)
    act_bytes = 6 * Bp * max_op * 4 + 2 * Bp * max_op * 2        # live f32/bf16 intermediates
    est_bytes = wbuf_bytes + 2 * small_bytes + act_bytes + (1 << 20)
    assert est_bytes <= budget, (
        "MLP working set too large for the fused kernel on this TPU generation; "
        "TODO(synk): tiled batch/feature path needed")

    kernel = _make_fused_mlp_kernel(nlayers, wshapes, B, Bp)

    in_specs = [
        pl.BlockSpec((Bp, dims_p[0]), lambda: (0, 0)),            # x
        pl.BlockSpec((nlayers - 1, nmid_p), lambda: (0, 0)),      # gammas
        pl.BlockSpec((nlayers - 1, nmid_p), lambda: (0, 0)),      # betas
        pl.BlockSpec((1, dims_p[-1]), lambda: (0, 0)),            # last-layer bias
    ] + [pl.BlockSpec(memory_space=pl.ANY)] * nlayers             # weights (HBM)

    out_p = pl.pallas_call(
        kernel,
        out_shape=jax.ShapeDtypeStruct((Bp, dims_p[-1]), jnp.float32),
        in_specs=in_specs,
        out_specs=pl.BlockSpec((Bp, dims_p[-1]), lambda: (0, 0)),
        scratch_shapes=[pltpu.VMEM((2, max_ip, max_op), jnp.bfloat16),
                        pltpu.SemaphoreType.DMA((2,))],
        compiler_params=pltpu.CompilerParams(
            vmem_limit_bytes=min(budget, 96 * 1024 * 1024)),
    )(x_p, gammas, betas, b_last, *w_list)

    return out_p[:B, :dims[-1]]


def mlp_reference(params, x):
    """Pure-JAX reference mirroring the kernel's numerics (bf16 matmul/activations,
    f32 BatchNorm math, hidden bias dropped -- exact since BN(xW+b) == BN(xW))."""
    h = x.astype(jnp.bfloat16)
    n = len(params)
    for i, p in enumerate(params):
        y = jnp.dot(h, p["w_t"].astype(jnp.bfloat16),
                    preferred_element_type=jnp.float32)
        if i < n - 1:
            mean = jnp.mean(y, axis=0, keepdims=True)
            var = jnp.mean((y - mean) ** 2, axis=0, keepdims=True)
            scale = p["gamma"][None, :] * jax.lax.rsqrt(var + _BN_EPS)
            shift = p["beta"][None, :] - mean * scale
            h = jnp.maximum(y * scale + shift, 0.0).astype(jnp.bfloat16)
        else:
            return y + p["b"][None, :]


if __name__ == "__main__":
    # Shapes consistent with MultiLayerPerceptron(nin=16, nmid=32, nout=8, nlayers=3)
    B, NIN, NMID, NOUT, NLAYERS = 8, 16, 32, 8, 3

    key = jax.random.PRNGKey(0)
    key, kx = jax.random.split(key)
    x = jax.random.normal(kx, (B, NIN), jnp.float32)

    params = init_mlp_params(key, NIN, NMID, NOUT, NLAYERS)

    out = jax.block_until_ready(mlp_forward(params, x))
    ref = mlp_reference(params, x)

    assert out.shape == (B, NOUT)
    # Tolerance covers rare 1-ulp bf16 re-rounding of intermediate activations between
    # the (mathematically identical) kernel and reference BN formulations.
    assert jnp.allclose(out, ref, atol=2e-3, rtol=2e-3), float(jnp.max(jnp.abs(out - ref)))

    print("KERNEL_OK")
</pallas_src>

<mosaic_0001>
module attributes {stable_mosaic.version = 11 : i64} {
  func.func @kernel(%arg0: memref<16x128xbf16, #tpu.memory_space<vmem>>, %arg1: memref<2x128xf32, #tpu.memory_space<vmem>>, %arg2: memref<2x128xf32, #tpu.memory_space<vmem>>, %arg3: memref<1x128xf32, #tpu.memory_space<vmem>>, %arg4: memref<128x128xbf16, #tpu.memory_space<any>>, %arg5: memref<128x128xbf16, #tpu.memory_space<any>>, %arg6: memref<128x128xbf16, #tpu.memory_space<any>>, %arg7: memref<16x128xf32, #tpu.memory_space<vmem>>, %arg8: memref<2x128x128xbf16, #tpu.memory_space<vmem>>, %arg9: memref<2x!tpu.dma_semaphore, #tpu.memory_space<semaphore_mem>>) attributes {dimension_semantics = [], scalar_prefetch = 0 : i64, scratch_operands = 2 : i64, tpu.core_type = #tpu.core_type<tc>} {
    %c0_i32 = arith.constant 0 : i32
    %c0_i32_0 = arith.constant 0 : i32
    %c0_i32_1 = arith.constant 0 : i32
    %c0_i32_2 = arith.constant 0 : i32
    %0 = tpu.memref_slice %arg8[%c0_i32, %c0_i32_1, %c0_i32_2] : memref<2x128x128xbf16, #tpu.memory_space<vmem>> -> memref<1x128x128xbf16, #tpu.memory_space<vmem>>
    %1 = tpu.memref_squeeze %0 : memref<1x128x128xbf16, #tpu.memory_space<vmem>> -> memref<128x128xbf16, #tpu.memory_space<vmem>>
    %2 = tpu.memref_slice %arg9[%c0_i32_0] : memref<2x!tpu.dma_semaphore, #tpu.memory_space<semaphore_mem>> -> memref<1x!tpu.dma_semaphore, #tpu.memory_space<semaphore_mem>>
    %3 = tpu.memref_squeeze %2 : memref<1x!tpu.dma_semaphore, #tpu.memory_space<semaphore_mem>> -> memref<!tpu.dma_semaphore, #tpu.memory_space<semaphore_mem>>
    tpu.enqueue_dma source(%arg4 : memref<128x128xbf16, #tpu.memory_space<any>>) target(%1 : memref<128x128xbf16, #tpu.memory_space<vmem>>) target_semaphore(%3 : memref<!tpu.dma_semaphore, #tpu.memory_space<semaphore_mem>>)
    %c0 = arith.constant 0 : index
    %c0_3 = arith.constant 0 : index
    %4 = vector.load %arg0[%c0, %c0_3] : memref<16x128xbf16, #tpu.memory_space<vmem>>, vector<16x128xbf16>
    %5 = tpu.iota {dimensions = array<i32: 0>} : vector<16x1xi32>
    %c8_i32 = arith.constant 8 : i32
    %6 = vector.broadcast %c8_i32 : i32 to vector<16x1xi32>
    %7 = arith.cmpi slt, %5, %6 : vector<16x1xi32>
    %c0_i32_4 = arith.constant 0 : i32
    %c0_i32_5 = arith.constant 0 : i32
    %c0_i32_6 = arith.constant 0 : i32
    %c0_i32_7 = arith.constant 0 : i32
    %8 = tpu.memref_slice %arg8[%c0_i32_4, %c0_i32_6, %c0_i32_7] : memref<2x128x128xbf16, #tpu.memory_space<vmem>> -> memref<1x128x128xbf16, #tpu.memory_space<vmem>>
    %9 = tpu.memref_squeeze %8 : memref<1x128x128xbf16, #tpu.memory_space<vmem>> -> memref<128x128xbf16, #tpu.memory_space<vmem>>
    %10 = tpu.memref_slice %arg9[%c0_i32_5] : memref<2x!tpu.dma_semaphore, #tpu.memory_space<semaphore_mem>> -> memref<1x!tpu.dma_semaphore, #tpu.memory_space<semaphore_mem>>
    %11 = tpu.memref_squeeze %10 : memref<1x!tpu.dma_semaphore, #tpu.memory_space<semaphore_mem>> -> memref<!tpu.dma_semaphore, #tpu.memory_space<semaphore_mem>>
    tpu.wait_dma2 semaphore(%11 : memref<!tpu.dma_semaphore, #tpu.memory_space<semaphore_mem>>) src(%arg4 : memref<128x128xbf16, #tpu.memory_space<any>>) dst(%9 : memref<128x128xbf16, #tpu.memory_space<vmem>>)
    %c1_i32 = arith.constant 1 : i32
    %c1_i32_8 = arith.constant 1 : i32
    %c0_i32_9 = arith.constant 0 : i32
    %c0_i32_10 = arith.constant 0 : i32
    %12 = tpu.memref_slice %arg8[%c1_i32, %c0_i32_9, %c0_i32_10] : memref<2x128x128xbf16, #tpu.memory_space<vmem>> -> memref<1x128x128xbf16, #tpu.memory_space<vmem>>
    %13 = tpu.memref_squeeze %12 : memref<1x128x128xbf16, #tpu.memory_space<vmem>> -> memref<128x128xbf16, #tpu.memory_space<vmem>>
    %14 = tpu.memref_slice %arg9[%c1_i32_8] : memref<2x!tpu.dma_semaphore, #tpu.memory_space<semaphore_mem>> -> memref<1x!tpu.dma_semaphore, #tpu.memory_space<semaphore_mem>>
    %15 = tpu.memref_squeeze %14 : memref<1x!tpu.dma_semaphore, #tpu.memory_space<semaphore_mem>> -> memref<!tpu.dma_semaphore, #tpu.memory_space<semaphore_mem>>
    tpu.enqueue_dma source(%arg5 : memref<128x128xbf16, #tpu.memory_space<any>>) target(%13 : memref<128x128xbf16, #tpu.memory_space<vmem>>) target_semaphore(%15 : memref<!tpu.dma_semaphore, #tpu.memory_space<semaphore_mem>>)
    %c0_11 = arith.constant 0 : index
    %c0_12 = arith.constant 0 : index
    %c0_13 = arith.constant 0 : index
    %16 = vector.load %arg8[%c0_11, %c0_12, %c0_13] : memref<2x128x128xbf16, #tpu.memory_space<vmem>>, vector<1x128x128xbf16>
    %17 = vector.shape_cast %16 : vector<1x128x128xbf16> to vector<128x128xbf16>
    %cst = arith.constant dense<0.000000e+00> : vector<16x128xf32>
    %18 = tpu.matmul %4, %17, %cst {dimension_numbers = #tpu.dot_dimension_numbers<[1], [0], [0], [1], [0, 0, 1, 1], [], []>} : vector<16x128xbf16>, vector<128x128xbf16>, vector<16x128xf32> -> vector<16x128xf32>
    %cst_14 = arith.constant dense<0.000000e+00> : vector<128xf32>
    %19 = vector.multi_reduction <add>, %18, %cst_14 [0] : vector<16x128xf32> to vector<128xf32>
    %20 = vector.shape_cast %19 : vector<128xf32> to vector<1x128xf32>
    %cst_15 = arith.constant 1.250000e-01 : f32
    %21 = vector.broadcast %cst_15 : f32 to vector<1x128xf32>
    %22 = arith.mulf %20, %21 : vector<1x128xf32>
    %23 = vector.broadcast %22 : vector<1x128xf32> to vector<16x128xf32>
    %24 = arith.subf %18, %23 : vector<16x128xf32>
    %25 = arith.mulf %24, %24 : vector<16x128xf32>
    %cst_16 = arith.constant dense<0.000000e+00> : vector<128xf32>
    %26 = vector.multi_reduction <add>, %25, %cst_16 [0] : vector<16x128xf32> to vector<128xf32>
    %27 = vector.shape_cast %26 : vector<128xf32> to vector<1x128xf32>
    %28 = arith.mulf %22, %22 : vector<1x128xf32>
    %cst_17 = arith.constant 8.000000e+00 : f32
    %29 = vector.broadcast %cst_17 : f32 to vector<1x128xf32>
    %30 = arith.mulf %29, %28 : vector<1x128xf32>
    %31 = arith.subf %27, %30 : vector<1x128xf32>
    %cst_18 = arith.constant 1.250000e-01 : f32
    %32 = vector.broadcast %cst_18 : f32 to vector<1x128xf32>
    %33 = arith.mulf %31, %32 : vector<1x128xf32>
    %cst_19 = arith.constant 0.000000e+00 : f32
    %34 = vector.broadcast %cst_19 : f32 to vector<1x128xf32>
    %35 = arith.maximumf %33, %34 : vector<1x128xf32>
    %c0_20 = arith.constant 0 : index
    %c0_21 = arith.constant 0 : index
    %36 = vector.load %arg1[%c0_20, %c0_21] : memref<2x128xf32, #tpu.memory_space<vmem>>, vector<1x128xf32>
    %cst_22 = arith.constant 9.99999974E-6 : f32
    %37 = vector.broadcast %cst_22 : f32 to vector<1x128xf32>
    %38 = arith.addf %35, %37 : vector<1x128xf32>
    %39 = math.rsqrt %38 : vector<1x128xf32>
    %40 = arith.mulf %36, %39 : vector<1x128xf32>
    %c0_23 = arith.constant 0 : index
    %c0_24 = arith.constant 0 : index
    %41 = vector.load %arg2[%c0_23, %c0_24] : memref<2x128xf32, #tpu.memory_space<vmem>>, vector<1x128xf32>
    %42 = arith.mulf %22, %40 : vector<1x128xf32>
    %43 = arith.subf %41, %42 : vector<1x128xf32>
    %44 = vector.broadcast %40 : vector<1x128xf32> to vector<16x128xf32>
    %45 = arith.mulf %18, %44 : vector<16x128xf32>
    %46 = vector.broadcast %43 : vector<1x128xf32> to vector<16x128xf32>
    %47 = arith.addf %45, %46 : vector<16x128xf32>
    %cst_25 = arith.constant 0.000000e+00 : f32
    %48 = vector.broadcast %cst_25 : f32 to vector<16x128xf32>
    %49 = arith.maximumf %47, %48 : vector<16x128xf32>
    %cst_26 = arith.constant 0.000000e+00 : f32
    %50 = vector.shape_cast %7 : vector<16x1xi1> to vector<16x1xi1>
    %51 = vector.broadcast %50 : vector<16x1xi1> to vector<16x128xi1>
    %52 = vector.broadcast %cst_26 : f32 to vector<16x128xf32>
    %53 = arith.select %51, %49, %52 : vector<16x128xi1>, vector<16x128xf32>
    %54 = arith.truncf %53 : vector<16x128xf32> to vector<16x128xbf16>
    %c1_i32_27 = arith.constant 1 : i32
    %c1_i32_28 = arith.constant 1 : i32
    %c0_i32_29 = arith.constant 0 : i32
    %c0_i32_30 = arith.constant 0 : i32
    %55 = tpu.memref_slice %arg8[%c1_i32_27, %c0_i32_29, %c0_i32_30] : memref<2x128x128xbf16, #tpu.memory_space<vmem>> -> memref<1x128x128xbf16, #tpu.memory_space<vmem>>
    %56 = tpu.memref_squeeze %55 : memref<1x128x128xbf16, #tpu.memory_space<vmem>> -> memref<128x128xbf16, #tpu.memory_space<vmem>>
    %57 = tpu.memref_slice %arg9[%c1_i32_28] : memref<2x!tpu.dma_semaphore, #tpu.memory_space<semaphore_mem>> -> memref<1x!tpu.dma_semaphore, #tpu.memory_space<semaphore_mem>>
    %58 = tpu.memref_squeeze %57 : memref<1x!tpu.dma_semaphore, #tpu.memory_space<semaphore_mem>> -> memref<!tpu.dma_semaphore, #tpu.memory_space<semaphore_mem>>
    tpu.wait_dma2 semaphore(%58 : memref<!tpu.dma_semaphore, #tpu.memory_space<semaphore_mem>>) src(%arg5 : memref<128x128xbf16, #tpu.memory_space<any>>) dst(%56 : memref<128x128xbf16, #tpu.memory_space<vmem>>)
    %c0_i32_31 = arith.constant 0 : i32
    %c0_i32_32 = arith.constant 0 : i32
    %c0_i32_33 = arith.constant 0 : i32
    %c0_i32_34 = arith.constant 0 : i32
    %59 = tpu.memref_slice %arg8[%c0_i32_31, %c0_i32_33, %c0_i32_34] : memref<2x128x128xbf16, #tpu.memory_space<vmem>> -> memref<1x128x128xbf16, #tpu.memory_space<vmem>>
    %60 = tpu.memref_squeeze %59 : memref<1x128x128xbf16, #tpu.memory_space<vmem>> -> memref<128x128xbf16, #tpu.memory_space<vmem>>
    %61 = tpu.memref_slice %arg9[%c0_i32_32] : memref<2x!tpu.dma_semaphore, #tpu.memory_space<semaphore_mem>> -> memref<1x!tpu.dma_semaphore, #tpu.memory_space<semaphore_mem>>
    %62 = tpu.memref_squeeze %61 : memref<1x!tpu.dma_semaphore, #tpu.memory_space<semaphore_mem>> -> memref<!tpu.dma_semaphore, #tpu.memory_space<semaphore_mem>>
    tpu.enqueue_dma source(%arg6 : memref<128x128xbf16, #tpu.memory_space<any>>) target(%60 : memref<128x128xbf16, #tpu.memory_space<vmem>>) target_semaphore(%62 : memref<!tpu.dma_semaphore, #tpu.memory_space<semaphore_mem>>)
    %c1 = arith.constant 1 : index
    %c0_35 = arith.constant 0 : index
    %c0_36 = arith.constant 0 : index
    %63 = vector.load %arg8[%c1, %c0_35, %c0_36] : memref<2x128x128xbf16, #tpu.memory_space<vmem>>, vector<1x128x128xbf16>
    %64 = vector.shape_cast %63 : vector<1x128x128xbf16> to vector<128x128xbf16>
    %cst_37 = arith.constant dense<0.000000e+00> : vector<16x128xf32>
    %65 = tpu.matmul %54, %64, %cst_37 {dimension_numbers = #tpu.dot_dimension_numbers<[1], [0], [0], [1], [0, 0, 1, 1], [], []>} : vector<16x128xbf16>, vector<128x128xbf16>, vector<16x128xf32> -> vector<16x128xf32>
    %cst_38 = arith.constant dense<0.000000e+00> : vector<128xf32>
    %66 = vector.multi_reduction <add>, %65, %cst_38 [0] : vector<16x128xf32> to vector<128xf32>
    %67 = vector.shape_cast %66 : vector<128xf32> to vector<1x128xf32>
    %cst_39 = arith.constant 1.250000e-01 : f32
    %68 = vector.broadcast %cst_39 : f32 to vector<1x128xf32>
    %69 = arith.mulf %67, %68 : vector<1x128xf32>
    %70 = vector.broadcast %69 : vector<1x128xf32> to vector<16x128xf32>
    %71 = arith.subf %65, %70 : vector<16x128xf32>
    %72 = arith.mulf %71, %71 : vector<16x128xf32>
    %cst_40 = arith.constant dense<0.000000e+00> : vector<128xf32>
    %73 = vector.multi_reduction <add>, %72, %cst_40 [0] : vector<16x128xf32> to vector<128xf32>
    %74 = vector.shape_cast %73 : vector<128xf32> to vector<1x128xf32>
    %75 = arith.mulf %69, %69 : vector<1x128xf32>
    %cst_41 = arith.constant 8.000000e+00 : f32
    %76 = vector.broadcast %cst_41 : f32 to vector<1x128xf32>
    %77 = arith.mulf %76, %75 : vector<1x128xf32>
    %78 = arith.subf %74, %77 : vector<1x128xf32>
    %cst_42 = arith.constant 1.250000e-01 : f32
    %79 = vector.broadcast %cst_42 : f32 to vector<1x128xf32>
    %80 = arith.mulf %78, %79 : vector<1x128xf32>
    %cst_43 = arith.constant 0.000000e+00 : f32
    %81 = vector.broadcast %cst_43 : f32 to vector<1x128xf32>
    %82 = arith.maximumf %80, %81 : vector<1x128xf32>
    %c1_44 = arith.constant 1 : index
    %c0_45 = arith.constant 0 : index
    %83 = vector.load %arg1[%c1_44, %c0_45] : memref<2x128xf32, #tpu.memory_space<vmem>>, vector<1x128xf32>
    %cst_46 = arith.constant 9.99999974E-6 : f32
    %84 = vector.broadcast %cst_46 : f32 to vector<1x128xf32>
    %85 = arith.addf %82, %84 : vector<1x128xf32>
    %86 = math.rsqrt %85 : vector<1x128xf32>
    %87 = arith.mulf %83, %86 : vector<1x128xf32>
    %c1_47 = arith.constant 1 : index
    %c0_48 = arith.constant 0 : index
    %88 = vector.load %arg2[%c1_47, %c0_48] : memref<2x128xf32, #tpu.memory_space<vmem>>, vector<1x128xf32>
    %89 = arith.mulf %69, %87 : vector<1x128xf32>
    %90 = arith.subf %88, %89 : vector<1x128xf32>
    %91 = vector.broadcast %87 : vector<1x128xf32> to vector<16x128xf32>
    %92 = arith.mulf %65, %91 : vector<16x128xf32>
    %93 = vector.broadcast %90 : vector<1x128xf32> to vector<16x128xf32>
    %94 = arith.addf %92, %93 : vector<16x128xf32>
    %cst_49 = arith.constant 0.000000e+00 : f32
    %95 = vector.broadcast %cst_49 : f32 to vector<16x128xf32>
    %96 = arith.maximumf %94, %95 : vector<16x128xf32>
    %cst_50 = arith.constant 0.000000e+00 : f32
    %97 = vector.shape_cast %7 : vector<16x1xi1> to vector<16x1xi1>
    %98 = vector.broadcast %97 : vector<16x1xi1> to vector<16x128xi1>
    %99 = vector.broadcast %cst_50 : f32 to vector<16x128xf32>
    %100 = arith.select %98, %96, %99 : vector<16x128xi1>, vector<16x128xf32>
    %101 = arith.truncf %100 : vector<16x128xf32> to vector<16x128xbf16>
    %c0_i32_51 = arith.constant 0 : i32
    %c0_i32_52 = arith.constant 0 : i32
    %c0_i32_53 = arith.constant 0 : i32
    %c0_i32_54 = arith.constant 0 : i32
    %102 = tpu.memref_slice %arg8[%c0_i32_51, %c0_i32_53, %c0_i32_54] : memref<2x128x128xbf16, #tpu.memory_space<vmem>> -> memref<1x128x128xbf16, #tpu.memory_space<vmem>>
    %103 = tpu.memref_squeeze %102 : memref<1x128x128xbf16, #tpu.memory_space<vmem>> -> memref<128x128xbf16, #tpu.memory_space<vmem>>
    %104 = tpu.memref_slice %arg9[%c0_i32_52] : memref<2x!tpu.dma_semaphore, #tpu.memory_space<semaphore_mem>> -> memref<1x!tpu.dma_semaphore, #tpu.memory_space<semaphore_mem>>
    %105 = tpu.memref_squeeze %104 : memref<1x!tpu.dma_semaphore, #tpu.memory_space<semaphore_mem>> -> memref<!tpu.dma_semaphore, #tpu.memory_space<semaphore_mem>>
    tpu.wait_dma2 semaphore(%105 : memref<!tpu.dma_semaphore, #tpu.memory_space<semaphore_mem>>) src(%arg6 : memref<128x128xbf16, #tpu.memory_space<any>>) dst(%103 : memref<128x128xbf16, #tpu.memory_space<vmem>>)
    %c0_55 = arith.constant 0 : index
    %c0_56 = arith.constant 0 : index
    %c0_57 = arith.constant 0 : index
    %106 = vector.load %arg8[%c0_55, %c0_56, %c0_57] : memref<2x128x128xbf16, #tpu.memory_space<vmem>>, vector<1x128x128xbf16>
    %107 = vector.shape_cast %106 : vector<1x128x128xbf16> to vector<128x128xbf16>
    %cst_58 = arith.constant dense<0.000000e+00> : vector<16x128xf32>
    %108 = tpu.matmul %101, %107, %cst_58 {dimension_numbers = #tpu.dot_dimension_numbers<[1], [0], [0], [1], [0, 0, 1, 1], [], []>} : vector<16x128xbf16>, vector<128x128xbf16>, vector<16x128xf32> -> vector<16x128xf32>
    %c0_59 = arith.constant 0 : index
    %c0_60 = arith.constant 0 : index
    %109 = vector.load %arg3[%c0_59, %c0_60] : memref<1x128xf32, #tpu.memory_space<vmem>>, vector<1x128xf32>
    %110 = vector.broadcast %109 : vector<1x128xf32> to vector<16x128xf32>
    %111 = arith.addf %108, %110 : vector<16x128xf32>
    %c0_61 = arith.constant 0 : index
    %c0_62 = arith.constant 0 : index
    %112 = vector.load %arg7[%c0_61, %c0_62] : memref<16x128xf32, #tpu.memory_space<vmem>>, vector<16x128xf32>
    tpu.vector_store %arg7[%c0_61, %c0_62], %111 {strides = array<i32>} : memref<16x128xf32, #tpu.memory_space<vmem>>, vector<16x128xf32>,
    return
  }
}

</mosaic_0001>

<bundles_post_ra>
// kernel: tpu_custom_call.1
= control target key start
LH: loop header
LB: loop body
LE: loop exit
PB: predicated region body
PF: predicated region fallthrough
CT: control target
= control target key end

     0   :  { %12 = vsyncpa [#allocation5], 0  ;;  %s798_s0 = inlined_call_operand.hbm [shape: bf16[16,128], index: 0, kind: input, shape index: {}]   ;;  %s799_s1 = inlined_call_operand.vmem [shape: f32[2,128], index: 1, kind: input, shape index: {}]   ;;  %s800_s2 = inlined_call_operand.vmem [shape: f32[2,128], index: 2, kind: input, shape index: {}]   ;;  %s801_s3 = inlined_call_operand.vmem [shape: f32[1,128], index: 3, kind: input, shape index: {}]   ;;  %s802_s4 = inlined_call_operand.hbm [shape: bf16[128,128], index: 4, kind: input, shape index: {}]   ;;  %s803_s5 = inlined_call_operand.hbm [shape: bf16[128,128], index: 5, kind: input, shape index: {}]   ;;  %s804_s6 = inlined_call_operand.hbm [shape: bf16[128,128], index: 6, kind: input, shape index: {}]   ;;  %s805_s7 = inlined_call_operand.hbm [shape: f32[16,128], index: 7, kind: output, shape index: {}]  }
   0x1   :  { %13 = vsyncpa [#allocation6], 0  ;;  %s603_s24 = smov [#allocation4]   ;;  %s483_s28 = scalar_lea.hbm %s798_s0, 128 }
   0x2   :  { %s19_s25 = sshll.u32 %s603_s24, 4  ;;  %p484_p0 = scmp.ne.s32.totalorder %s798_s0, %s483_s28  ;;  %s20_s25 = int_to_ptr.vmem [resolvable:$true] %s19_s25 }
   0x3   :  { %p487_p1 = scmp.lt.u32.totalorder %s483_s28, %s798_s0 }
   0x5   :  { %p489_p2 = pnand %p487_p1, %p484_p0 }
   0x7   :  { %492 = shalt.err (!%p489_p2)
}
   0x8   :  { %s493_s10 = scalar_lea.vmem %s20_s25, 128  ;;  %p498_p4 = scmp.lt.s32.totalorder %s20_s25, %s20_s25 }
   0x9   :  { %p494_p3 = scmp.ne.s32.totalorder %s20_s25, %s493_s10  ;;  %p499_p5 = scmp.lt.s32.totalorder %s493_s10, %s493_s10 }
   0xb   :  { %p500_p6 = por %p499_p5, %p498_p4 }
   0xd   :  { %p501_p7 = pnand %p500_p6, %p494_p3 }
   0xf   :  { %504 = shalt.err (!%p501_p7)
}
  0x10   :  { %s604_s11 = smov 64   ;;  %s605_s12 = smov 4  }
  0x11   :  { %25 = dma.hbm_to_vmem [thread:$0]  %s798_s0, 128, %s20_s25, [#allocation5], %s604_s11, %s604_s11, %s605_s12  }
  0x12   :  { %593 = dma.done.wait [#allocation5], 128  }
  0x13   :  { %594 = vsyncadd [#allocation5], 4294967168  ;;  %s606_s15 = smov [#allocation2]   ;;  %s505_s19 = scalar_lea.hbm %s802_s4, 1024 }
  0x14   :  { %s43_s16 = sshll.u32 %s606_s15, 4  ;;  %p506_p8 = scmp.ne.s32.totalorder %s802_s4, %s505_s19  ;;  %s665_s16 = int_to_ptr.vmem [resolvable:$true] %s43_s16 }
  0x15   :  { %p509_p9 = scmp.lt.u32.totalorder %s505_s19, %s802_s4 }
  0x17   :  { %p511_p10 = pnand %p509_p9, %p506_p8 }
  0x19   :  { %514 = shalt.err (!%p511_p10)  }
  0x1a   :  { %s515_s0 = scalar_lea.vmem %s665_s16, 1024  ;;  %s519_s25 = scalar_lea.vmem %s665_s16, 2048 }
  0x1b   :  { %p678_p11 = scmp.ne.s32.totalorder %s665_s16, %s515_s0  ;;  %p520_p12 = scmp.lt.s32.totalorder %s665_s16, %s665_s16 }
  0x1c   :  { %p521_p13 = scmp.lt.s32.totalorder %s519_s25, %s515_s0 }
  0x1e   :  { %p685_p0 = por %p521_p13, %p520_p12 }
  0x20   :  { %p523_p1 = pnand %p685_p0, %p678_p11 }
  0x22   :  { %526 = shalt.err (!%p523_p1)  }
  0x23   :  { %46 = dma.hbm_to_vmem [thread:$0]  %s802_s4, 1024, %s665_s16, [#allocation3]  ;;  %v47_v0 = vld [vmem:[#allocation4] sm:$0xf]  ;;  %v48_v1 = vld [vmem:[#allocation4 + $0x4] sm:$0xf] }
  0x24   :  { %595 = dma.done.wait [#allocation3], 1024 }
  0x25   :  { %596 = vsyncadd [#allocation3], 4294966272  ;;  %s607_s29 = smov [#allocation2 + $0x40]   ;;  %v608_v2 = vmov 0.0   ;;  %vm609_vm0 = vmmov 0   ;;  %s527_s10 = scalar_lea.hbm %s803_s5, 1024 }
  0x26   :  { %s67_s30 = sshll.u32 %s607_s29, 4  ;;  %409 = vmatprep.subr.bf16.mxu0 %v608_v2  ;;  %425 = vmatprep.mubr.msk.bf16.mxu0 %vm609_vm0, %v608_v2  ;;  %p528_p2 = scmp.ne.s32.totalorder %s803_s5, %s527_s10  ;;  %s68_s30 = int_to_ptr.vmem [resolvable:$true] %s67_s30 }
  0x27   :  { %p531_p3 = scmp.lt.u32.totalorder %s527_s10, %s803_s5 }
  0x29   :  { %p533_p4 = pnand %p531_p3, %p528_p2 }
  0x2b   :  { %536 = shalt.err (!%p533_p4)  }
  0x2c   :  { %s537_s14 = scalar_lea.vmem %s68_s30, 1024  ;;  %p542_p6 = scmp.lt.s32.totalorder %s68_s30, %s665_s16 }
  0x2d   :  { %p538_p5 = scmp.ne.s32.totalorder %s68_s30, %s537_s14  ;;  %p543_p7 = scmp.lt.s32.totalorder %s519_s25, %s537_s14 }
  0x2f   :  { %p544_p8 = por %p543_p7, %p542_p6 }
  0x31   :  { %p545_p9 = pnand %p544_p8, %p538_p5 }
  0x33   :  { %548 = shalt.err (!%p545_p9)  }
  0x34   :  { %70 = dma.hbm_to_vmem [thread:$0]  %s803_s5, 1024, %s68_s30, [#allocation3 + $0x1]  ;;  %v378_v11 = vcombine.low %v47_v0, %v48_v1  ;;  %v157_v41 = vlaneseq  ;;  %v150_v43 = vld [vmem:[%s799_s1] sm:$0x1] }
  0x35   :  { %v71_v3 = vld [vmem:[#allocation2] sm:$0xff]  ;;  %v72_v4 = vld [vmem:[#allocation2 + $0x8] sm:$0xff]  ;;  %v73_v5 = vld [vmem:[#allocation2 + $0x10] sm:$0xff] }
  0x36   :  { %410 = vmatpush3.bf16.msra.mxu0 %v71_v3  ;;  %v74_v6 = vld [vmem:[#allocation2 + $0x18] sm:$0xff]  ;;  %v75_v7 = vld [vmem:[#allocation2 + $0x20] sm:$0xff]  ;;  %v76_v8 = vld [vmem:[#allocation2 + $0x28] sm:$0xff]  ;;  %v158_v42 = vshrl.u32 %v157_v41, 7 }
  0x37   :  { %411 = vmatprep.subr.bf16.mxu0 %v608_v2  ;;  %v77_v9 = vld [vmem:[#allocation2 + $0x30] sm:$0xff]  ;;  %v78_v10 = vld [vmem:[#allocation2 + $0x38] sm:$0xff]  ;;  %v154_v47 = vld [vmem:[%s800_s2] sm:$0x1] }
  0x38   :  { %v728_v44 = vsub.s32 0, %v158_v42 }
  0x3a   :  { %412 = vmatpush3.bf16.msra.mxu0 %v72_v4 }
  0x3b   :  { %413 = vmatprep.subr.bf16.mxu0 %v608_v2 }
  0x3e   :  { %414 = vmatpush3.bf16.msra.mxu0 %v73_v5 }
  0x3f   :  { %415 = vmatprep.subr.bf16.mxu0 %v608_v2 }
  0x42   :  { %416 = vmatpush3.bf16.msra.mxu0 %v74_v6 }
  0x43   :  { %417 = vmatprep.subr.bf16.mxu0 %v608_v2 }
  0x46   :  { %418 = vmatpush3.bf16.msra.mxu0 %v75_v7 }
  0x47   :  { %419 = vmatprep.subr.bf16.mxu0 %v608_v2 }
  0x4a   :  { %420 = vmatpush3.bf16.msra.mxu0 %v76_v8 }
  0x4b   :  { %421 = vmatprep.subr.bf16.mxu0 %v608_v2 }
  0x4e   :  { %422 = vmatpush3.bf16.msra.mxu0 %v77_v9 }
  0x4f   :  { %423 = vmatprep.subr.bf16.mxu0 %v608_v2 }
  0x52   :  { %424 = vmatpush3.bf16.msra.mxu0 %v78_v10 }
  0x55   :  { %426 = vmatmul.mubr.bf16.vlgmr.msra.gmra.mrb[0].mxu0 %v378_v11 }
 0x128   :  { %v119_v12 = vpop.f32.mrb[0].mxu0 }
 0x129   :  { %v427_v13 = vpop.f32.mrb[1].mxu0 }
 0x12a   :  { %v122_v14 = vpop.f32.mrb[2].mxu0 }
 0x12b   :  { %v126_v15 = vadd.f32 %v122_v14, %v119_v12  ;;  %v428_v16 = vpop.f32.mrb[3].mxu0 }
 0x12d   :  { %v127_v17 = vrot.slane %v126_v15, 4 }
 0x12f   :  { %v128_v18 = vadd.f32 %v127_v17, %v126_v15 }
 0x131   :  { %v129_v19 = vrot.slane %v128_v18, 2 }
 0x133   :  { %v130_v20 = vadd.f32 %v129_v19, %v128_v18 }
 0x135   :  { %v131_v21 = vrot.slane %v130_v20, 1 }
 0x137   :  { %v132_v22 = vadd.f32 %v131_v21, %v130_v20 }
 0x139   :  { %v133_v23 = vmul.f32 0.125, %v132_v22 }
 0x13b   :  { %v134_v24 = vsub.f32 %v119_v12, %v133_v23  ;;  %v135_v25 = vsub.f32 %v122_v14, %v133_v23  ;;  %v145_v33 = vmul.f32 %v133_v23, %v133_v23 }
 0x13d   :  { %v136_v26 = vmul.f32 %v134_v24, %v134_v24  ;;  %v137_v27 = vmul.f32 %v135_v25, %v135_v25  ;;  %v146_v36 = vmul.f32 8.0, %v145_v33 }
 0x13f   :  { %v138_v28 = vadd.f32 %v137_v27, %v136_v26 }
 0x141   :  { %v139_v29 = vrot.slane %v138_v28, 4 }
 0x143   :  { %v140_v30 = vadd.f32 %v139_v29, %v138_v28 }
 0x145   :  { %v141_v31 = vrot.slane %v140_v30, 2 }
 0x147   :  { %v142_v32 = vadd.f32 %v141_v31, %v140_v30 }
 0x149   :  { %v143_v34 = vrot.slane %v142_v32, 1 }
 0x14b   :  { %v144_v35 = vadd.f32 %v143_v34, %v142_v32 }
 0x14d   :  { %v147_v37 = vsub.f32 %v144_v35, %v146_v36 }
 0x14f   :  { %v148_v38 = vmul.f32 0.125, %v147_v37 }
 0x151   :  { %v149_v39 = vmax.f32 %v148_v38, 0.0 }
 0x153   :  { %v151_v40 = vadd.f32 1e-05, %v149_v39 }
 0x155   :  { %479 = vrsqrt.f32 %v151_v40 }
 0x15f   :  { %v480_v45 = vpop.eup %479 }
 0x160   :  { %v153_v46 = vmul.f32 %v480_v45, %v150_v43 }
 0x162   :  { %v155_v48 = vmul.f32 %v153_v46, %v133_v23  ;;  %v160_v49 = vrot.slane %v153_v46, %v728_v44 }
 0x164   :  { %v156_v50 = vsub.f32 %v154_v47, %v155_v48  ;;  %v161_v51 = vmul.f32 %v160_v49, %v119_v12 }
 0x166   :  { %v166_v52 = vrot.slane %v156_v50, %v728_v44 }
 0x168   :  { %v167_v53 = vadd.f32 %v166_v52, %v161_v51 }
 0x16a   :  { %v169_v54 = vmax.f32 %v167_v53, 0.0 }
 0x16c   :  { %v177_v55 = vpack.c.bf16 %v608_v2, %v169_v54 }
 0x16d   :  { %597 = dma.done.wait [#allocation3 + $0x1], 1024 }
 0x16e   :  { %598 = vsyncadd [#allocation3 + $0x1], 4294966272  ;;  %429 = vmatprep.subr.bf16.mxu1 %v608_v2  ;;  %445 = vmatprep.mubr.msk.bf16.mxu1 %vm609_vm0, %v608_v2  ;;  %s549_s23 = scalar_lea.hbm %s804_s6, 1024 }
 0x16f   :  { %p550_p10 = scmp.ne.s32.totalorder %s804_s6, %s549_s23  ;;  %p553_p12 = scmp.lt.u32.totalorder %s549_s23, %s804_s6 }
 0x171   :  { %p555_p13 = pnand %p553_p12, %p550_p10 }
 0x173   :  { %558 = shalt.err (!%p555_p13)  }
 0x174   :  { %570 = shalt.err (!%p523_p1)  }
 0x175   :  { %190 = dma.hbm_to_vmem [thread:$0]  %s804_s6, 1024, %s665_s16, [#allocation3]  ;;  %v264_v30 = vld [vmem:[%s799_s1 + $0x1] sm:$0x1] }
 0x176   :  { %v191_v56 = vld [vmem:[#allocation2 + $0x40] sm:$0xff]  ;;  %v192_v57 = vld [vmem:[#allocation2 + $0x48] sm:$0xff]  ;;  %v193_v58 = vld [vmem:[#allocation2 + $0x50] sm:$0xff] }
 0x177   :  { %430 = vmatpush3.bf16.msra.mxu1 %v191_v56  ;;  %v194_v59 = vld [vmem:[#allocation2 + $0x58] sm:$0xff]  ;;  %v195_v60 = vld [vmem:[#allocation2 + $0x60] sm:$0xff]  ;;  %v196_v61 = vld [vmem:[#allocation2 + $0x68] sm:$0xff] }
 0x178   :  { %431 = vmatprep.subr.bf16.mxu1 %v608_v2  ;;  %v197_v62 = vld [vmem:[#allocation2 + $0x70] sm:$0xff]  ;;  %v198_v63 = vld [vmem:[#allocation2 + $0x78] sm:$0xff]  ;;  %v268_v33 = vld [vmem:[%s800_s2 + $0x1] sm:$0x1] }
 0x17b   :  { %432 = vmatpush3.bf16.msra.mxu1 %v192_v57 }
 0x17c   :  { %433 = vmatprep.subr.bf16.mxu1 %v608_v2 }
 0x17f   :  { %434 = vmatpush3.bf16.msra.mxu1 %v193_v58 }
 0x180   :  { %435 = vmatprep.subr.bf16.mxu1 %v608_v2 }
 0x183   :  { %436 = vmatpush3.bf16.msra.mxu1 %v194_v59 }
 0x184   :  { %437 = vmatprep.subr.bf16.mxu1 %v608_v2 }
 0x187   :  { %438 = vmatpush3.bf16.msra.mxu1 %v195_v60 }
 0x188   :  { %439 = vmatprep.subr.bf16.mxu1 %v608_v2 }
 0x18b   :  { %440 = vmatpush3.bf16.msra.mxu1 %v196_v61 }
 0x18c   :  { %441 = vmatprep.subr.bf16.mxu1 %v608_v2 }
 0x18f   :  { %442 = vmatpush3.bf16.msra.mxu1 %v197_v62 }
 0x190   :  { %443 = vmatprep.subr.bf16.mxu1 %v608_v2 }
 0x193   :  { %444 = vmatpush3.bf16.msra.mxu1 %v198_v63 }
 0x196   :  { %446 = vmatmul.mubr.bf16.vlgmr.msra.gmra.mrb[0].mxu1 %v177_v55 }
 0x269   :  { %v233_v0 = vpop.f32.mrb[0].mxu1 }
 0x26a   :  { %v447_v1 = vpop.f32.mrb[1].mxu1 }
 0x26b   :  { %v236_v3 = vpop.f32.mrb[2].mxu1 }
 0x26c   :  { %v240_v4 = vadd.f32 %v236_v3, %v233_v0  ;;  %v448_v5 = vpop.f32.mrb[3].mxu1 }
 0x26e   :  { %v241_v6 = vrot.slane %v240_v4, 4 }
 0x270   :  { %v242_v7 = vadd.f32 %v241_v6, %v240_v4 }
 0x272   :  { %v243_v8 = vrot.slane %v242_v7, 2 }
 0x274   :  { %v244_v9 = vadd.f32 %v243_v8, %v242_v7 }
 0x276   :  { %v245_v10 = vrot.slane %v244_v9, 1 }
 0x278   :  { %v246_v11 = vadd.f32 %v245_v10, %v244_v9 }
 0x27a   :  { %v247_v12 = vmul.f32 0.125, %v246_v11 }
 0x27c   :  { %v248_v13 = vsub.f32 %v233_v0, %v247_v12  ;;  %v249_v14 = vsub.f32 %v236_v3, %v247_v12  ;;  %v259_v22 = vmul.f32 %v247_v12, %v247_v12 }
 0x27e   :  { %v250_v15 = vmul.f32 %v248_v13, %v248_v13  ;;  %v251_v16 = vmul.f32 %v249_v14, %v249_v14  ;;  %v260_v25 = vmul.f32 8.0, %v259_v22 }
 0x280   :  { %v252_v17 = vadd.f32 %v251_v16, %v250_v15 }
 0x282   :  { %v253_v18 = vrot.slane %v252_v17, 4 }
 0x284   :  { %v254_v19 = vadd.f32 %v253_v18, %v252_v17 }
 0x286   :  { %v255_v20 = vrot.slane %v254_v19, 2 }
 0x288   :  { %v256_v21 = vadd.f32 %v255_v20, %v254_v19 }
 0x28a   :  { %v257_v23 = vrot.slane %v256_v21, 1 }
 0x28c   :  { %v258_v24 = vadd.f32 %v257_v23, %v256_v21 }
 0x28e   :  { %v261_v26 = vsub.f32 %v258_v24, %v260_v25 }
 0x290   :  { %v262_v27 = vmul.f32 0.125, %v261_v26 }
 0x292   :  { %v263_v28 = vmax.f32 %v262_v27, 0.0 }
 0x294   :  { %v265_v29 = vadd.f32 1e-05, %v263_v28 }
 0x296   :  { %481 = vrsqrt.f32 %v265_v29 }
 0x2a0   :  { %v482_v31 = vpop.eup %481 }
 0x2a1   :  { %v267_v32 = vmul.f32 %v482_v31, %v264_v30 }
 0x2a3   :  { %v269_v34 = vmul.f32 %v267_v32, %v247_v12  ;;  %v274_v35 = vrot.slane %v267_v32, %v728_v44 }
 0x2a5   :  { %v270_v36 = vsub.f32 %v268_v33, %v269_v34  ;;  %v275_v37 = vmul.f32 %v274_v35, %v233_v0 }
 0x2a7   :  { %v280_v38 = vrot.slane %v270_v36, %v728_v44 }
 0x2a9   :  { %v281_v39 = vadd.f32 %v280_v38, %v275_v37 }
 0x2ab   :  { %v283_v40 = vmax.f32 %v281_v39, 0.0 }
 0x2ad   :  { %v287_v41 = vpack.c.bf16 %v608_v2, %v283_v40 }
 0x2ae   :  { %599 = dma.done.wait [#allocation3], 1024 }
 0x2af   :  { %600 = vsyncadd [#allocation3], 4294966272  ;;  %449 = vmatprep.subr.bf16.mxu0 %v608_v2  ;;  %465 = vmatprep.mubr.msk.bf16.mxu0 %vm609_vm0, %v608_v2  ;;  %v290_v42 = vld [vmem:[#allocation2] sm:$0xff]  ;;  %v291_v43 = vld [vmem:[#allocation2 + $0x8] sm:$0xff]  ;;  %s610_s8 = smov [#allocation7]  }
 0x2b0   :  { %450 = vmatpush3.bf16.msra.mxu0 %v290_v42  ;;  %v292_v44 = vld [vmem:[#allocation2 + $0x10] sm:$0xff]  ;;  %v293_v45 = vld [vmem:[#allocation2 + $0x18] sm:$0xff]  ;;  %v294_v46 = vld [vmem:[#allocation2 + $0x20] sm:$0xff]  ;;  %s353_s9 = sshll.u32 %s610_s8, 4  ;;  %s354_s9 = int_to_ptr.vmem [resolvable:$true] %s353_s9 }
 0x2b1   :  { %451 = vmatprep.subr.bf16.mxu0 %v608_v2  ;;  %v295_v47 = vld [vmem:[#allocation2 + $0x28] sm:$0xff]  ;;  %v296_v48 = vld [vmem:[#allocation2 + $0x30] sm:$0xff]  ;;  %v297_v49 = vld [vmem:[#allocation2 + $0x38] sm:$0xff]  ;;  %s571_s10 = scalar_lea.vmem %s354_s9, 256  ;;  %p576_p0 = scmp.lt.s32.totalorder %s354_s9, %s354_s9 }
 0x2b2   :  { %v379_v50 = vld [vmem:[%s801_s3] ss:$0 sm:$0xff]  ;;  %p572_p11 = scmp.ne.s32.totalorder %s354_s9, %s571_s10  ;;  %p577_p1 = scmp.lt.s32.totalorder %s571_s10, %s571_s10 }
 0x2b4   :  { %452 = vmatpush3.bf16.msra.mxu0 %v291_v43  ;;  %p578_p2 = por %p577_p1, %p576_p0 }
 0x2b5   :  { %453 = vmatprep.subr.bf16.mxu0 %v608_v2 }
 0x2b6   :  { %p579_p3 = pnand %p578_p2, %p572_p11 }
 0x2b8   :  { %454 = vmatpush3.bf16.msra.mxu0 %v292_v44 }
 0x2b9   :  { %455 = vmatprep.subr.bf16.mxu0 %v608_v2 }
 0x2bc   :  { %456 = vmatpush3.bf16.msra.mxu0 %v293_v45 }
 0x2bd   :  { %457 = vmatprep.subr.bf16.mxu0 %v608_v2 }
 0x2c0   :  { %458 = vmatpush3.bf16.msra.mxu0 %v294_v46 }
 0x2c1   :  { %459 = vmatprep.subr.bf16.mxu0 %v608_v2 }
 0x2c4   :  { %460 = vmatpush3.bf16.msra.mxu0 %v295_v47 }
 0x2c5   :  { %461 = vmatprep.subr.bf16.mxu0 %v608_v2 }
 0x2c8   :  { %462 = vmatpush3.bf16.msra.mxu0 %v296_v48 }
 0x2c9   :  { %463 = vmatprep.subr.bf16.mxu0 %v608_v2 }
 0x2cc   :  { %464 = vmatpush3.bf16.msra.mxu0 %v297_v49 }
 0x2cf   :  { %466 = vmatmul.mubr.bf16.vlgmr.msra.gmra.mrb[4].mxu0 %v287_v41 }
 0x3a2   :  { %v339_v51 = vpop.f32.mrb[4].mxu0 }
 0x3a3   :  { %v340_v52 = vadd.f32 %v379_v50, %v339_v51  ;;  %v467_v53 = vpop.f32.mrb[5].mxu0 }
 0x3a4   :  { %v342_v54 = vpop.f32.mrb[6].mxu0 }
 0x3a5   :  { %346 = vst [vmem:[#allocation7] sm:$0xff] %v340_v52  ;;  %v343_v55 = vadd.f32 %v379_v50, %v342_v54  ;;  %v468_v56 = vpop.f32.mrb[7].mxu0 }
 0x3a7   :  { %347 = vst [vmem:[#allocation7 + $0x8] sm:$0xff] %v343_v55 }
 0x3a8   :  { %582 = shalt.err (!%p579_p3)
}
 0x3a9   :  { %s583_s4 = scalar_lea.hbm %s805_s7, 256 }
 0x3aa   :  { %p584_p4 = scmp.ne.s32.totalorder %s805_s7, %s583_s4  ;;  %p587_p5 = scmp.lt.u32.totalorder %s583_s4, %s805_s7 }
 0x3ac   :  { %p589_p6 = pnand %p587_p5, %p584_p4 }
 0x3ae   :  { %592 = shalt.err (!%p589_p6)
}
 0x3af   :  { %s611_s17 = smov 128   ;;  %s612_s5 = smov 8  }
 0x3b0   :  { %359 = dma.vmem_to_hbm [thread:$0]  %s354_s9, 256, %s805_s7, [#allocation6], %s611_s17, %s611_s17, %s612_s5  }
 0x3b1   :  { %601 = dma.done.wait [#allocation6], 256  }
 0x3b2   :  { %602 = vsyncadd [#allocation6], 4294967040 }
 0x3b3   :  { %363 = vsyncpa [#allocation5], 1 }
 0x3b4   :  { %364 = vsyncpa [#allocation6], 1 }
 0x3b5   :  { %365 = vsyncmov [#allocation3] }
 0x3b8   :  { %s366_s20 = vpop.sfrf %365 }
 0x3b9   :  { %p380_p7 = scmp.ne.s32.totalorder %s366_s20, 0 }
 0x3bb   :  { %370 = shalt.err (%p380_p7)  }
 0x3bc   :  { %372 = vsyncmov [#allocation3 + $0x1] }
 0x3bf   :  { %s373_s21 = vpop.sfrf %372 }
 0x3c0   :  { %p381_p8 = scmp.ne.s32.totalorder %s373_s21, 0 }
 0x3c2   :  { %377 = shalt.err (%p381_p8)  }

</bundles_post_ra>
